<compile_context>
chip_gen: v5e
topology: v5e:2x2
jax: 0.10.0
libtpu: 0.0.40
codegen_flags: <defaults>
</compile_context>

<pallas_src>
import jax
import jax.numpy as jnp
from jax.experimental import pallas as pl
from jax.experimental.pallas import tpu as pltpu


IN_FEATURES = 400
NUM_CLASSES = 25
ROW_TILE = 512  # rows of x / output per grid step on the batched path


# ----------------------------- Pallas kernel -----------------------------

def _linear_softmax_kernel(x_ref, w_ref, b_ref, o_ref):
    """Fused: logits = x @ W + b ; probs = softmax(logits, axis=-1)."""
    # Single-pass bf16 MXU matmul with fp32 accumulation (weights are bf16 already).
    x = x_ref[...].astype(jnp.bfloat16)
    logits = jnp.dot(x, w_ref[...], preferred_element_type=jnp.float32)
    logits = logits + b_ref[...]
    # numerically stable softmax over the class axis (dim=1)
    m = jnp.max(logits, axis=-1, keepdims=True)
    e = jnp.exp(logits - m)
    denom = jnp.sum(e, axis=-1, keepdims=True)
    # reciprocal on the EUP slot instead of a VPU divide sequence
    o_ref[...] = (e * pl.reciprocal(denom, approx=True)).astype(o_ref.dtype)


def linear_softmax(x, w_in_out, bias):
    """x: (N, K) f32 ; w_in_out: (K, C) bf16 ; bias: (C,) f32  ->  probs (N, C) f32."""
    N, K = x.shape
    K2, C = w_in_out.shape
    assert K == K2
    b2 = bias.reshape(1, C)
    out_shape = jax.ShapeDtypeStruct((N, C), jnp.float32)

    if N <= ROW_TILE:
        # Whole problem (< 1 MiB) fits one VMEM block on every generation:
        # launch grid-less -- no pipeline prologue/epilogue, no per-step overhead.
        return pl.pallas_call(
            _linear_softmax_kernel,
            out_shape=out_shape,
            in_specs=[
                pl.BlockSpec(memory_space=pltpu.MemorySpace.VMEM),
                pl.BlockSpec(memory_space=pltpu.MemorySpace.VMEM),
                pl.BlockSpec(memory_space=pltpu.MemorySpace.VMEM),
            ],
            out_specs=pl.BlockSpec(memory_space=pltpu.MemorySpace.VMEM),
        )(x, w_in_out, b2)

    # Batch-tiled path: 512-row x/output blocks (double-buffered by the BlockSpec
    # pipeline), weight + bias VMEM-resident across all grid steps (constant
    # index_map), batch axis "parallel" so v7x's two TensorCores split it.
    return pl.pallas_call(
        _linear_softmax_kernel,
        out_shape=out_shape,
        grid=(pl.cdiv(N, ROW_TILE),),
        in_specs=[
            pl.BlockSpec((ROW_TILE, K), lambda i: (i, 0)),
            pl.BlockSpec((K, C), lambda i: (0, 0)),
            pl.BlockSpec((1, C), lambda i: (0, 0)),
        ],
        out_specs=pl.BlockSpec((ROW_TILE, C), lambda i: (i, 0)),
        compiler_params=pltpu.CompilerParams(
            dimension_semantics=("parallel",)),
    )(x, w_in_out, b2)


# ----------------------------- parameters -----------------------------

def init_params(key):
    k_w, k_b = jax.random.split(key)
    # PyTorch Linear weight layout is (out_features, in_features); transpose ONCE
    # here and cast to bf16 ONCE here (not per forward / not in-kernel).
    w_torch = 0.05 * jax.random.normal(
        k_w, (NUM_CLASSES, IN_FEATURES), dtype=jnp.float32)
    b = 0.05 * jax.random.normal(k_b, (NUM_CLASSES,), dtype=jnp.float32)
    return {
        "fc1_w": jnp.transpose(w_torch).astype(jnp.bfloat16),  # (K, C) bf16
        "fc1_b": b,                                            # (C,)  f32
    }


# ----------------------------- forward -----------------------------

def classifier_forward(x, params):
    return linear_softmax(x, params["fc1_w"], params["fc1_b"])


def reference_forward(x, params):
    # Same numerics as the kernel (bf16 inputs, fp32 accumulation), exact divide.
    logits = jnp.dot(x.astype(jnp.bfloat16), params["fc1_w"],
                     preferred_element_type=jnp.float32) + params["fc1_b"]
    return jax.nn.softmax(logits, axis=1)


# ----------------------------- main -----------------------------

def _run_and_check(fwd, x, params):
    probs = jax.block_until_ready(fwd(x, params))
    assert probs.shape == (x.shape[0], NUM_CLASSES), probs.shape
    assert bool(jnp.all(jnp.isfinite(probs)))
    # softmax rows must sum to 1 (approx reciprocal => loose-but-tight tolerance)
    assert bool(jnp.all(jnp.abs(jnp.sum(probs, axis=1) - 1.0) < 5e-3))
    ref = reference_forward(x, params)
    assert bool(jnp.max(jnp.abs(probs - ref)) < 2e-3)
    return probs


if __name__ == "__main__":
    key = jax.random.PRNGKey(0)
    k_params, k_x_small, k_x_big = jax.random.split(key, 3)
    params = init_params(k_params)

    fwd = jax.jit(classifier_forward)

    # small batch (as in the module's typical use) -> grid-less single-block path
    x_small = jax.random.normal(k_x_small, (2, IN_FEATURES), dtype=jnp.float32)
    _run_and_check(fwd, x_small, params)

    # larger batch -> batch-tiled, weight-resident, "parallel" path (2 grid steps)
    x_big = jax.random.normal(
        k_x_big, (2 * ROW_TILE, IN_FEATURES), dtype=jnp.float32)
    _run_and_check(fwd, x_big, params)

    print("KERNEL_OK")
</pallas_src>

<mosaic_0001>
module attributes {stable_mosaic.version = 11 : i64} {
  func.func @_linear_softmax_kernel(%arg0: memref<2x400xf32, #tpu.memory_space<vmem>>, %arg1: memref<400x25xbf16, #tpu.memory_space<vmem>>, %arg2: memref<1x25xf32, #tpu.memory_space<vmem>>, %arg3: memref<2x25xf32, #tpu.memory_space<vmem>>) attributes {dimension_semantics = [], scalar_prefetch = 0 : i64, scratch_operands = 0 : i64, tpu.core_type = #tpu.core_type<tc>} {
    %c0 = arith.constant 0 : index
    %c0_0 = arith.constant 0 : index
    %0 = vector.load %arg0[%c0, %c0_0] : memref<2x400xf32, #tpu.memory_space<vmem>>, vector<2x400xf32>
    %1 = arith.truncf %0 : vector<2x400xf32> to vector<2x400xbf16>
    %c0_1 = arith.constant 0 : index
    %c0_2 = arith.constant 0 : index
    %2 = vector.load %arg1[%c0_1, %c0_2] : memref<400x25xbf16, #tpu.memory_space<vmem>>, vector<400x25xbf16>
    %cst = arith.constant dense<0.000000e+00> : vector<2x25xf32>
    %3 = tpu.matmul %1, %2, %cst {dimension_numbers = #tpu.dot_dimension_numbers<[1], [0], [0], [1], [0, 0, 1, 1], [], []>} : vector<2x400xbf16>, vector<400x25xbf16>, vector<2x25xf32> -> vector<2x25xf32>
    %c0_3 = arith.constant 0 : index
    %c0_4 = arith.constant 0 : index
    %4 = vector.load %arg2[%c0_3, %c0_4] : memref<1x25xf32, #tpu.memory_space<vmem>>, vector<1x25xf32>
    %5 = vector.broadcast %4 : vector<1x25xf32> to vector<2x25xf32>
    %6 = arith.addf %3, %5 : vector<2x25xf32>
    %cst_5 = arith.constant dense<0xFF800000> : vector<2xf32>
    %7 = vector.multi_reduction <maximumf>, %6, %cst_5 [1] : vector<2x25xf32> to vector<2xf32>
    %8 = vector.shape_cast %7 : vector<2xf32> to vector<2x1xf32>
    %9 = vector.broadcast %8 : vector<2x1xf32> to vector<2x25xf32>
    %10 = arith.subf %6, %9 : vector<2x25xf32>
    %11 = math.exp %10 : vector<2x25xf32>
    %cst_6 = arith.constant dense<0.000000e+00> : vector<2xf32>
    %12 = vector.multi_reduction <add>, %11, %cst_6 [1] : vector<2x25xf32> to vector<2xf32>
    %13 = vector.shape_cast %12 : vector<2xf32> to vector<2x1xf32>
    %14 = tpu.reciprocal %13 {approx = true} : vector<2x1xf32> -> vector<2x1xf32>
    %15 = vector.broadcast %14 : vector<2x1xf32> to vector<2x25xf32>
    %16 = arith.mulf %11, %15 : vector<2x25xf32>
    %c0_7 = arith.constant 0 : index
    %c0_8 = arith.constant 0 : index
    %17 = vector.load %arg3[%c0_7, %c0_8] : memref<2x25xf32, #tpu.memory_space<vmem>>, vector<2x25xf32>
    tpu.vector_store %arg3[%c0_7, %c0_8], %16 {strides = array<i32>} : memref<2x25xf32, #tpu.memory_space<vmem>>, vector<2x25xf32>,
    return
  }
}

</mosaic_0001>

<bundles_post_ra>
// kernel: classifier_forward.1
= control target key start
LH: loop header
LB: loop body
LE: loop exit
PB: predicated region body
PF: predicated region fallthrough
CT: control target
= control target key end

     0   :  { %s586_s0 = inlined_call_operand.vmem [shape: f32[2,400], index: 0, kind: input, shape index: {}]   ;;  %s587_s1 = inlined_call_operand.vmem [shape: bf16[400,25], index: 1, kind: input, shape index: {}]   ;;  %s588_s2 = inlined_call_operand.vmem [shape: f32[1,25], index: 2, kind: input, shape index: {}]   ;;  %s589_s3 = inlined_call_operand.hbm [shape: f32[2,25], index: 3, kind: output, shape index: {}]  }
   0x1   :  { %v428_v0 = vld [vmem:[%s587_s1 + $0x38] sm:$0xff]  ;;  %v427_v3 = vld [vmem:[%s587_s1 + $0x30] sm:$0xff]  ;;  %v426_v6 = vld [vmem:[%s587_s1 + $0x28] sm:$0xff] }
   0x2   :  { %v436_v1 = vld [vmem:[%s587_s1 + $0x78] sm:$0xff]  ;;  %239 = vmatpush.bf16.msra.mxu0 %v428_v0  ;;  %v435_v4 = vld [vmem:[%s587_s1 + $0x70] sm:$0xff]  ;;  %v434_v7 = vld [vmem:[%s587_s1 + $0x68] sm:$0xff] }
   0x3   :  { %v444_v2 = vld [vmem:[%s587_s1 + $0xb8] sm:$0xff]  ;;  %252 = vmatpush.bf16.msra.mxu1 %v436_v1  ;;  %v443_v5 = vld [vmem:[%s587_s1 + $0xb0] sm:$0xff]  ;;  %v445_v8 = vld [vmem:[%s587_s1 + $0xc0] sm:$0xff] }
   0x4   :  { %265 = vmatpush.bf16.msra.mxu2 %v444_v2  ;;  %v442_v9 = vld [vmem:[%s587_s1 + $0xa8] sm:$0xff]  ;;  %v16_v10 = vld [vmem:[%s586_s0] sm:$0xff]  ;;  %285 = vmatpush.bf16.msra.mxu3 %v445_v8 }
   0x5   :  { %18 = vst [vmem:[#allocation1] ss:$4 sm:$0xff] %v16_v10 }
   0x6   :  { %240 = vmatpush.bf16.msra.mxu0 %v427_v3 }
   0x7   :  { %253 = vmatpush.bf16.msra.mxu1 %v435_v4 }
   0x8   :  { %266 = vmatpush.bf16.msra.mxu2 %v443_v5 }
   0x9   :  { %8 = vsyncpa [#allocation3], 0  ;;  %v425_v11 = vld [vmem:[%s587_s1 + $0x20] sm:$0xff]  ;;  %v424_v14 = vld [vmem:[%s587_s1 + $0x18] sm:$0xff]  ;;  %vm235_vm0 = vcmask 130048   ;;  %vm291_vm1 = vcmask 197632  }
   0xa   :  { %241 = vmatpush.bf16.msra.mxu0 %v426_v6  ;;  %v433_v12 = vld [vmem:[%s587_s1 + $0x60] sm:$0xff]  ;;  %v432_v15 = vld [vmem:[%s587_s1 + $0x58] sm:$0xff]  ;;  %v423_v19 = vld [vmem:[%s587_s1 + $0x10] sm:$0xff]  ;;  %s311_s0 = sshll.u32 %s589_s3, 4  ;;  %s312_s0 = int_to_ptr.hbm [resolvable:$true] %s311_s0 }
   0xb   :  { %254 = vmatpush.bf16.msra.mxu1 %v434_v7  ;;  %v441_v13 = vld [vmem:[%s587_s1 + $0xa0] sm:$0xff]  ;;  %v440_v16 = vld [vmem:[%s587_s1 + $0x98] sm:$0xff]  ;;  %v431_v20 = vld [vmem:[%s587_s1 + $0x50] sm:$0xff] }
   0xc   :  { %267 = vmatpush.bf16.msra.mxu2 %v442_v9  ;;  %v22_v17 = vld.sshfl [vmem:[#allocation1 + $0x18] sm:$0xff pattern:$0x73625140]  ;;  %v439_v21 = vld [vmem:[%s587_s1 + $0x90] sm:$0xff]  ;;  %v422_v22 = vld [vmem:[%s587_s1 + $0x8] sm:$0xff] }
   0xd   :  { %v30_v18 = vpack.c.bf16 %v22_v17, %v22_v17  ;;  %v430_v23 = vld [vmem:[%s587_s1 + $0x48] sm:$0xff]  ;;  %v421_v25 = vld [vmem:[%s587_s1] sm:$0xff]  ;;  %v21_v30 = vld.sshfl [vmem:[#allocation1 + $0x10] sm:$0xff pattern:$0x73625140] }
   0xe   :  { %242 = vmatpush.bf16.msra.mxu0 %v425_v11  ;;  %v438_v24 = vld [vmem:[%s587_s1 + $0x88] sm:$0xff]  ;;  %v429_v26 = vld [vmem:[%s587_s1 + $0x40] sm:$0xff]  ;;  %v29_v33 = vpack.c.bf16 %v21_v30, %v21_v30 }
   0xf   :  { %255 = vmatpush.bf16.msra.mxu1 %v433_v12  ;;  %420 = vmatmul.msk.bf16.vlgmr.msra.gmra.mxu3 %vm235_vm0, %v30_v18  ;;  %v19_v27 = vld.sshfl [vmem:[#allocation1] sm:$0xff pattern:$0x73625140]  ;;  %v20_v28 = vld.sshfl [vmem:[#allocation1 + $0x8] sm:$0xff pattern:$0x73625140] }
  0x10   :  { %268 = vmatpush.bf16.msra.mxu2 %v441_v13  ;;  %v437_v29 = vld [vmem:[%s587_s1 + $0x80] sm:$0xff]  ;;  %v27_v31 = vpack.c.bf16 %v19_v27, %v19_v27  ;;  %v28_v32 = vpack.c.bf16 %v20_v28, %v20_v28  ;;  %s478_s1 = smov [#allocation2]  }
  0x11   :  { %v447_v35 = vld [vmem:[%s588_s2] ss:$0 sm:$0xff]  ;;  %s309_s2 = sshll.u32 %s478_s1, 4  ;;  %s310_s2 = int_to_ptr.vmem [resolvable:$true] %s309_s2 }
  0x12   :  { %243 = vmatpush.bf16.msra.mxu0 %v424_v14 }
  0x13   :  { %256 = vmatpush.bf16.msra.mxu1 %v432_v15 }
  0x14   :  { %269 = vmatpush.bf16.msra.mxu2 %v440_v16 }
  0x16   :  { %244 = vmatpush.bf16.msra.mxu0 %v423_v19 }
  0x17   :  { %257 = vmatpush.bf16.msra.mxu1 %v431_v20 }
  0x18   :  { %270 = vmatpush.bf16.msra.mxu2 %v439_v21 }
  0x1a   :  { %245 = vmatpush.bf16.msra.mxu0 %v422_v22 }
  0x1b   :  { %258 = vmatpush.bf16.msra.mxu1 %v430_v23 }
  0x1c   :  { %271 = vmatpush.bf16.msra.mxu2 %v438_v24 }
  0x1e   :  { %246 = vmatpush.bf16.msra.mxu0 %v421_v25 }
  0x1f   :  { %259 = vmatpush.bf16.msra.mxu1 %v429_v26 }
  0x20   :  { %272 = vmatpush.bf16.msra.mxu2 %v437_v29 }
  0x21   :  { %247 = vmatmul.bf16.vlgmr.msra.gmra.mxu0 %v27_v31 }
  0x22   :  { %260 = vmatmul.bf16.vlgmr.msra.gmra.mxu1 %v28_v32 }
  0x23   :  { %273 = vmatmul.bf16.vlgmr.msra.gmra.mxu2 %v29_v33 }
  0x92   :  { %v287_v34 = vpop.f32.mrf.mxu3 }
  0x9a   :  { %v289_v39 = vpop.f32.mrf.mxu3 }
  0x9e   :  { %v248_v36 = vpop.f32.mrf.mxu0 }
  0x9f   :  { %v261_v37 = vpop.f32.mrf.mxu1  ;;  %v249_v38 = vadd.f32 %v447_v35, %v248_v36 }
  0xa1   :  { %v262_v40 = vadd.f32 %v261_v37, %v249_v38 }
  0xa6   :  { %v274_v41 = vpop.f32.mrf.mxu2  ;;  %v250_v43 = vpop.f32.mrf.mxu0 }
  0xa7   :  { %v275_v42 = vadd.f32 %v274_v41, %v262_v40  ;;  %v263_v44 = vpop.f32.mrf.mxu1 }
  0xa9   :  { %v288_v45 = vadd.f32 %v287_v34, %v275_v42 }
  0xab   :  { %v292_v46 = vsel %vm291_vm1, %v288_v45, -inf }
  0xac   :  { %293 = vmax.xlane.f32.xlu0 %v292_v46 }
  0xae   :  { %v276_v47 = vpop.f32.mrf.mxu2 }
 0x11f   :  { %v294_v48 = vpop.xlane.xlu0 %293 }
 0x120   :  { %v295_v49 = vsub.f32 %v288_v45, %v294_v48 }
 0x122   :  { %v296_v50 = vmul.f32 1.442695, %v295_v49 }
 0x124   :  { %448 = vpow2.f32 %v296_v50 }
 0x12a   :  { %v449_v51 = vpop.eup %448 }
 0x12b   :  { %v298_v52 = vsel %vm291_vm1, %v449_v51, 0.0 }
 0x12c   :  { %299 = vadd.xlane.f32.xlu0 %v298_v52 }
 0x19f   :  { %v300_v53 = vpop.xlane.xlu0 %299 }
 0x1a0   :  { %450 = vrcp.f32 %v300_v53 }
 0x1a6   :  { %v451_v54 = vpop.eup %450 }
 0x1a7   :  { %v302_v55 = vmul.f32 %v451_v54, %v449_v51 }
 0x1a9   :  { %303 = vst.msk [vmem:[#allocation2] sm:$0x3] %vm291_vm1, %v302_v55 }
 0x1aa   :  { %314 = dma.vmem_to_hbm [thread:$0]  %s310_s2, 32, %s312_s0, [#allocation3]  }
 0x1ab   :  { %476 = dma.done.wait [#allocation3], 32  }
 0x1ac   :  { %477 = vsyncadd [#allocation3], 4294967264 }
 0x1ad   :  { %319 = vsyncpa [#allocation3], 1 }

</bundles_post_ra>
